<compile_context>
chip_gen: v5e
topology: v5e:2x2
jax: 0.10.0
libtpu: 0.0.40
codegen_flags: <defaults>
</compile_context>

<pallas_src>
import jax
import jax.numpy as jnp
from jax.experimental import pallas as pl
from jax.experimental.pallas import tpu as pltpu


# ---------------------------------------------------------------------------
# Tuning knobs
# ---------------------------------------------------------------------------
_LANE = 128                               # vreg lane width / HBM tile minor dim
_DMA_ALIGN_BYTES = 512                    # keep DMA dest offsets 512-B aligned
_MIN_DMA_RUN_BYTES = 512                  # min contiguous bytes per row run
_TARGET_DMAS_PER_INPUT = 4                # desired in-flight chunks per input
_SMALL_BYPASS_BYTES = 512 * 1024          # below this, XLA concat wins
_VMEM_FALLBACK_BUDGET = 8 * 1024 * 1024   # conservative VMEM budget (fallback)


# ---------------------------------------------------------------------------
# Fast path: chunked HBM->HBM DMA copy
# ---------------------------------------------------------------------------
def _row_col_chunks(n_rows, n_cols, itemsize, target):
    """Static (row0, nrows, col0, ncols) chunks exactly tiling (n_rows, n_cols).

    Rows are split first (cheap, preserves contiguity); columns are split only
    at lane/512-B aligned boundaries and only if rows alone can't reach
    `target` chunks.
    """
    align = max(_LANE, _DMA_ALIGN_BYTES // itemsize)

    n_row = max(1, min(n_rows, target))
    row_bounds = [(i * n_rows) // n_row for i in range(n_row + 1)]

    n_col = 1
    if n_row < target and n_cols % align == 0:
        n_slices = n_cols // align
        n_col = max(1, min(target // n_row, n_slices))
    if n_col > 1:
        n_slices = n_cols // align
        col_bounds = [((i * n_slices) // n_col) * align for i in range(n_col)]
        col_bounds.append(n_cols)
    else:
        col_bounds = [0, n_cols]

    chunks = []
    for ri in range(len(row_bounds) - 1):
        r0, r1 = row_bounds[ri], row_bounds[ri + 1]
        if r1 <= r0:
            continue
        for ci in range(len(col_bounds) - 1):
            c0, c1 = col_bounds[ci], col_bounds[ci + 1]
            if c1 <= c0:
                continue
            chunks.append((r0, r1 - r0, c0, c1 - c0))
    return chunks


def _make_concat_dma_kernel(t_chunks, v_chunks, d1):
    """Kernel factory: statically unrolled DMA chunks for t and v."""
    n_t = len(t_chunks)

    def kernel(t_hbm, v_hbm, o_hbm, sem):
        copies = []
        for i, (r0, nr, c0, nc) in enumerate(t_chunks):
            copies.append(pltpu.make_async_copy(
                t_hbm.at[pl.ds(r0, nr), pl.ds(c0, nc)],
                o_hbm.at[pl.ds(r0, nr), pl.ds(c0, nc)],
                sem.at[i]))
        for j, (r0, nr, c0, nc) in enumerate(v_chunks):
            copies.append(pltpu.make_async_copy(
                v_hbm.at[pl.ds(r0, nr), pl.ds(c0, nc)],
                o_hbm.at[pl.ds(r0, nr), pl.ds(d1 + c0, nc)],
                sem.at[n_t + j]))
        # Issue every DMA before waiting on any, so all chunks are in flight
        # concurrently and the DMA engines can overlap toward the HBM roofline.
        for cp in copies:
            cp.start()
        for cp in copies:
            cp.wait()

    return kernel


def _concat_dma(t2, v2, B, d1, d2, itemsize):
    t_chunks = _row_col_chunks(B, d1, itemsize, _TARGET_DMAS_PER_INPUT)
    v_chunks = _row_col_chunks(B, d2, itemsize, _TARGET_DMAS_PER_INPUT)

    # Correctness guard: the output is written exclusively by these DMAs, so
    # the chunks must exactly tile each input slab (and hence the output).
    assert sum(nr * nc for _, nr, _, nc in t_chunks) == B * d1
    assert sum(nr * nc for _, nr, _, nc in v_chunks) == B * d2
    assert all(r0 + nr <= B and c0 + nc <= d1 for r0, nr, c0, nc in t_chunks)
    assert all(r0 + nr <= B and c0 + nc <= d2 for r0, nr, c0, nc in v_chunks)

    n_dma = len(t_chunks) + len(v_chunks)
    kernel = _make_concat_dma_kernel(t_chunks, v_chunks, d1)

    return pl.pallas_call(
        kernel,
        out_shape=jax.ShapeDtypeStruct((B, d1 + d2), t2.dtype),
        in_specs=[
            pl.BlockSpec(memory_space=pl.ANY),   # t stays in HBM
            pl.BlockSpec(memory_space=pl.ANY),   # v stays in HBM
        ],
        out_specs=pl.BlockSpec(memory_space=pl.ANY),  # written by DMA only
        scratch_shapes=[pltpu.SemaphoreType.DMA((n_dma,))],
        compiler_params=pltpu.CompilerParams(has_side_effects=True),
        cost_estimate=pl.CostEstimate(
            flops=0,
            transcendentals=0,
            # each byte read once from HBM and written once to HBM
            bytes_accessed=2 * B * (d1 + d2) * itemsize,
        ),
    )(t2, v2)


# ---------------------------------------------------------------------------
# Fallback path: BlockSpec-tiled VMEM copy (misaligned d1 / short rows)
# ---------------------------------------------------------------------------
def _concat_vmem_kernel(t_ref, v_ref, o_ref):
    # Build the full concatenated row block in registers, then do one
    # lane-dense whole-block store (avoids unaligned partial stores at the
    # d1 boundary; relayout is handled by the concatenate lowering).
    o_ref[...] = jnp.concatenate((t_ref[...], v_ref[...]), axis=-1)


def _concat_vmem(t2, v2, B, d1, d2, itemsize):
    D = d1 + d2
    # Double-buffered blocks of t, v and out per grid step ~ 4 * tb * D bytes.
    row_bytes = 4 * D * itemsize
    max_rows = _VMEM_FALLBACK_BUDGET // max(row_bytes, 1)
    if max_rows >= B:
        tb = B                      # whole array in one block
    elif max_rows >= 8:
        tb = (max_rows // 8) * 8    # multiple of 8 (sublane constraint)
    else:
        return None                 # a single row doesn't fit the VMEM budget

    grid = (pl.cdiv(B, tb),)
    return pl.pallas_call(
        _concat_vmem_kernel,
        out_shape=jax.ShapeDtypeStruct((B, D), t2.dtype),
        grid=grid,
        in_specs=[
            pl.BlockSpec((tb, d1), lambda i: (i, 0)),
            pl.BlockSpec((tb, d2), lambda i: (i, 0)),
        ],
        out_specs=pl.BlockSpec((tb, D), lambda i: (i, 0)),
        compiler_params=pltpu.CompilerParams(
            dimension_semantics=("parallel",)),
        cost_estimate=pl.CostEstimate(
            flops=0, transcendentals=0,
            bytes_accessed=2 * B * D * itemsize),
    )(t2, v2)


# ---------------------------------------------------------------------------
# Public wrapper: torch.cat((t, v), dim=1) for NCHW (or any >=2-D) inputs
# ---------------------------------------------------------------------------
def concat_fusion(t, v, *, force_kernel=False):
    assert t.shape[0] == v.shape[0], "batch dims must match"
    assert t.shape[2:] == v.shape[2:], "trailing spatial dims must match"
    assert t.dtype == v.dtype, "dtypes must match"

    B = t.shape[0]
    c1, c2 = t.shape[1], v.shape[1]
    rest = tuple(t.shape[2:])

    # Trivial edge cases (empty slab on either side).
    if c1 == 0:
        return v
    if c2 == 0:
        return t

    # Flatten to (B, C*H*W): a free metadata op for contiguous NCHW inputs;
    # turns the channel concat into a column concat of 2-D slabs.
    t2 = t.reshape(B, -1)
    v2 = v.reshape(B, -1)
    d1, d2 = t2.shape[1], v2.shape[1]
    D = d1 + d2
    itemsize = jnp.dtype(t.dtype).itemsize
    total_bytes = B * D * itemsize

    def _finish(out2):
        return out2.reshape((B, c1 + c2) + rest)

    # 1) Tiny inputs: pallas_call fixed cost (launch, sem alloc, DMA setup)
    #    dominates and XLA's concat can fuse with neighbors — bypass.
    if not force_kernel and total_bytes < _SMALL_BYPASS_BYTES:
        return _finish(jnp.concatenate((t2, v2), axis=1))

    # 2) Alignment / contiguous-run guards for the strided HBM->HBM DMA path.
    align_elems = max(_LANE, _DMA_ALIGN_BYTES // itemsize)
    dest_aligned = (d1 % align_elems == 0)
    long_rows = min(d1, d2) * itemsize >= _MIN_DMA_RUN_BYTES

    if dest_aligned and long_rows:
        return _finish(_concat_dma(t2, v2, B, d1, d2, itemsize))

    # 3) Misaligned d1 or short rows: VMEM-tiled copy kernel.
    out2 = _concat_vmem(t2, v2, B, d1, d2, itemsize)
    if out2 is None:
        # TODO(synk): column-tiled VMEM fallback for rows too large for VMEM;
        # XLA's native concat covers this rare case correctly in the meantime.
        out2 = jnp.concatenate((t2, v2), axis=1)
    return _finish(out2)


# ---------------------------------------------------------------------------
# Self-test
# ---------------------------------------------------------------------------
if __name__ == "__main__":
    key = jax.random.PRNGKey(0)
    k_t, k_v, k_tm, k_vm = jax.random.split(key, 4)

    fused = jax.jit(lambda a, b: concat_fusion(a, b, force_kernel=True))

    # Primary test: aligned NCHW shapes (d1 = 4*16*16 = 1024 -> lane/512-B
    # aligned) exercising the chunked HBM->HBM DMA fast path.
    t = jax.random.normal(k_t, (2, 4, 16, 16), dtype=jnp.float32)
    v = jax.random.normal(k_v, (2, 4, 16, 16), dtype=jnp.float32)
    out = jax.block_until_ready(fused(t, v))
    ref = jnp.concatenate((t, v), axis=1)
    assert out.shape == ref.shape, (out.shape, ref.shape)
    assert jnp.array_equal(out, ref), "DMA path mismatch vs reference"

    # Secondary test: misaligned channel split (d1 = 3*10*10 = 300) exercising
    # the VMEM-tiled fallback path.
    tm = jax.random.normal(k_tm, (2, 3, 10, 10), dtype=jnp.float32)
    vm = jax.random.normal(k_vm, (2, 5, 10, 10), dtype=jnp.float32)
    out_m = jax.block_until_ready(fused(tm, vm))
    ref_m = jnp.concatenate((tm, vm), axis=1)
    assert out_m.shape == ref_m.shape, (out_m.shape, ref_m.shape)
    assert jnp.array_equal(out_m, ref_m), "VMEM fallback mismatch vs reference"

    # Default routing: tiny inputs bypass the kernel (launch-overhead guard).
    out_b = jax.block_until_ready(jax.jit(concat_fusion)(t, v))
    assert jnp.array_equal(out_b, ref), "small-input bypass mismatch"

    print("KERNEL_OK")
</pallas_src>

<mosaic_0001>
module attributes {stable_mosaic.version = 11 : i64} {
  func.func @kernel(%arg0: memref<2x1024xf32, #tpu.memory_space<any>>, %arg1: memref<2x1024xf32, #tpu.memory_space<any>>, %arg2: memref<2x2048xf32, #tpu.memory_space<any>>, %arg3: memref<8x!tpu.dma_semaphore, #tpu.memory_space<semaphore_mem>>) attributes {dimension_semantics = [], scalar_prefetch = 0 : i64, scratch_operands = 1 : i64, tpu.core_type = #tpu.core_type<tc>} {
    %c0_i32 = arith.constant 0 : i32
    %c0_i32_0 = arith.constant 0 : i32
    %c0_i32_1 = arith.constant 0 : i32
    %0 = tpu.memref_slice %arg0[%c0_i32_0, %c0_i32_1] : memref<2x1024xf32, #tpu.memory_space<any>> -> memref<1x512xf32, #tpu.memory_space<any>>
    %c0_i32_2 = arith.constant 0 : i32
    %c0_i32_3 = arith.constant 0 : i32
    %1 = tpu.memref_slice %arg2[%c0_i32_2, %c0_i32_3] : memref<2x2048xf32, #tpu.memory_space<any>> -> memref<1x512xf32, #tpu.memory_space<any>>
    %2 = tpu.memref_slice %arg3[%c0_i32] : memref<8x!tpu.dma_semaphore, #tpu.memory_space<semaphore_mem>> -> memref<1x!tpu.dma_semaphore, #tpu.memory_space<semaphore_mem>>
    %3 = tpu.memref_squeeze %2 : memref<1x!tpu.dma_semaphore, #tpu.memory_space<semaphore_mem>> -> memref<!tpu.dma_semaphore, #tpu.memory_space<semaphore_mem>>
    tpu.enqueue_dma source(%0 : memref<1x512xf32, #tpu.memory_space<any>>) target(%1 : memref<1x512xf32, #tpu.memory_space<any>>) target_semaphore(%3 : memref<!tpu.dma_semaphore, #tpu.memory_space<semaphore_mem>>)
    %c1_i32 = arith.constant 1 : i32
    %c0_i32_4 = arith.constant 0 : i32
    %c512_i32 = arith.constant 512 : i32
    %4 = tpu.memref_slice %arg0[%c0_i32_4, %c512_i32] : memref<2x1024xf32, #tpu.memory_space<any>> -> memref<1x512xf32, #tpu.memory_space<any>>
    %c0_i32_5 = arith.constant 0 : i32
    %c512_i32_6 = arith.constant 512 : i32
    %5 = tpu.memref_slice %arg2[%c0_i32_5, %c512_i32_6] : memref<2x2048xf32, #tpu.memory_space<any>> -> memref<1x512xf32, #tpu.memory_space<any>>
    %6 = tpu.memref_slice %arg3[%c1_i32] : memref<8x!tpu.dma_semaphore, #tpu.memory_space<semaphore_mem>> -> memref<1x!tpu.dma_semaphore, #tpu.memory_space<semaphore_mem>>
    %7 = tpu.memref_squeeze %6 : memref<1x!tpu.dma_semaphore, #tpu.memory_space<semaphore_mem>> -> memref<!tpu.dma_semaphore, #tpu.memory_space<semaphore_mem>>
    tpu.enqueue_dma source(%4 : memref<1x512xf32, #tpu.memory_space<any>>) target(%5 : memref<1x512xf32, #tpu.memory_space<any>>) target_semaphore(%7 : memref<!tpu.dma_semaphore, #tpu.memory_space<semaphore_mem>>)
    %c2_i32 = arith.constant 2 : i32
    %c1_i32_7 = arith.constant 1 : i32
    %c0_i32_8 = arith.constant 0 : i32
    %8 = tpu.memref_slice %arg0[%c1_i32_7, %c0_i32_8] : memref<2x1024xf32, #tpu.memory_space<any>> -> memref<1x512xf32, #tpu.memory_space<any>>
    %c1_i32_9 = arith.constant 1 : i32
    %c0_i32_10 = arith.constant 0 : i32
    %9 = tpu.memref_slice %arg2[%c1_i32_9, %c0_i32_10] : memref<2x2048xf32, #tpu.memory_space<any>> -> memref<1x512xf32, #tpu.memory_space<any>>
    %10 = tpu.memref_slice %arg3[%c2_i32] : memref<8x!tpu.dma_semaphore, #tpu.memory_space<semaphore_mem>> -> memref<1x!tpu.dma_semaphore, #tpu.memory_space<semaphore_mem>>
    %11 = tpu.memref_squeeze %10 : memref<1x!tpu.dma_semaphore, #tpu.memory_space<semaphore_mem>> -> memref<!tpu.dma_semaphore, #tpu.memory_space<semaphore_mem>>
    tpu.enqueue_dma source(%8 : memref<1x512xf32, #tpu.memory_space<any>>) target(%9 : memref<1x512xf32, #tpu.memory_space<any>>) target_semaphore(%11 : memref<!tpu.dma_semaphore, #tpu.memory_space<semaphore_mem>>)
    %c3_i32 = arith.constant 3 : i32
    %c1_i32_11 = arith.constant 1 : i32
    %c512_i32_12 = arith.constant 512 : i32
    %12 = tpu.memref_slice %arg0[%c1_i32_11, %c512_i32_12] : memref<2x1024xf32, #tpu.memory_space<any>> -> memref<1x512xf32, #tpu.memory_space<any>>
    %c1_i32_13 = arith.constant 1 : i32
    %c512_i32_14 = arith.constant 512 : i32
    %13 = tpu.memref_slice %arg2[%c1_i32_13, %c512_i32_14] : memref<2x2048xf32, #tpu.memory_space<any>> -> memref<1x512xf32, #tpu.memory_space<any>>
    %14 = tpu.memref_slice %arg3[%c3_i32] : memref<8x!tpu.dma_semaphore, #tpu.memory_space<semaphore_mem>> -> memref<1x!tpu.dma_semaphore, #tpu.memory_space<semaphore_mem>>
    %15 = tpu.memref_squeeze %14 : memref<1x!tpu.dma_semaphore, #tpu.memory_space<semaphore_mem>> -> memref<!tpu.dma_semaphore, #tpu.memory_space<semaphore_mem>>
    tpu.enqueue_dma source(%12 : memref<1x512xf32, #tpu.memory_space<any>>) target(%13 : memref<1x512xf32, #tpu.memory_space<any>>) target_semaphore(%15 : memref<!tpu.dma_semaphore, #tpu.memory_space<semaphore_mem>>)
    %c4_i32 = arith.constant 4 : i32
    %c0_i32_15 = arith.constant 0 : i32
    %c0_i32_16 = arith.constant 0 : i32
    %16 = tpu.memref_slice %arg1[%c0_i32_15, %c0_i32_16] : memref<2x1024xf32, #tpu.memory_space<any>> -> memref<1x512xf32, #tpu.memory_space<any>>
    %c0_i32_17 = arith.constant 0 : i32
    %c1024_i32 = arith.constant 1024 : i32
    %17 = tpu.memref_slice %arg2[%c0_i32_17, %c1024_i32] : memref<2x2048xf32, #tpu.memory_space<any>> -> memref<1x512xf32, #tpu.memory_space<any>>
    %18 = tpu.memref_slice %arg3[%c4_i32] : memref<8x!tpu.dma_semaphore, #tpu.memory_space<semaphore_mem>> -> memref<1x!tpu.dma_semaphore, #tpu.memory_space<semaphore_mem>>
    %19 = tpu.memref_squeeze %18 : memref<1x!tpu.dma_semaphore, #tpu.memory_space<semaphore_mem>> -> memref<!tpu.dma_semaphore, #tpu.memory_space<semaphore_mem>>
    tpu.enqueue_dma source(%16 : memref<1x512xf32, #tpu.memory_space<any>>) target(%17 : memref<1x512xf32, #tpu.memory_space<any>>) target_semaphore(%19 : memref<!tpu.dma_semaphore, #tpu.memory_space<semaphore_mem>>)
    %c5_i32 = arith.constant 5 : i32
    %c0_i32_18 = arith.constant 0 : i32
    %c512_i32_19 = arith.constant 512 : i32
    %20 = tpu.memref_slice %arg1[%c0_i32_18, %c512_i32_19] : memref<2x1024xf32, #tpu.memory_space<any>> -> memref<1x512xf32, #tpu.memory_space<any>>
    %c0_i32_20 = arith.constant 0 : i32
    %c1536_i32 = arith.constant 1536 : i32
    %21 = tpu.memref_slice %arg2[%c0_i32_20, %c1536_i32] : memref<2x2048xf32, #tpu.memory_space<any>> -> memref<1x512xf32, #tpu.memory_space<any>>
    %22 = tpu.memref_slice %arg3[%c5_i32] : memref<8x!tpu.dma_semaphore, #tpu.memory_space<semaphore_mem>> -> memref<1x!tpu.dma_semaphore, #tpu.memory_space<semaphore_mem>>
    %23 = tpu.memref_squeeze %22 : memref<1x!tpu.dma_semaphore, #tpu.memory_space<semaphore_mem>> -> memref<!tpu.dma_semaphore, #tpu.memory_space<semaphore_mem>>
    tpu.enqueue_dma source(%20 : memref<1x512xf32, #tpu.memory_space<any>>) target(%21 : memref<1x512xf32, #tpu.memory_space<any>>) target_semaphore(%23 : memref<!tpu.dma_semaphore, #tpu.memory_space<semaphore_mem>>)
    %c6_i32 = arith.constant 6 : i32
    %c1_i32_21 = arith.constant 1 : i32
    %c0_i32_22 = arith.constant 0 : i32
    %24 = tpu.memref_slice %arg1[%c1_i32_21, %c0_i32_22] : memref<2x1024xf32, #tpu.memory_space<any>> -> memref<1x512xf32, #tpu.memory_space<any>>
    %c1_i32_23 = arith.constant 1 : i32
    %c1024_i32_24 = arith.constant 1024 : i32
    %25 = tpu.memref_slice %arg2[%c1_i32_23, %c1024_i32_24] : memref<2x2048xf32, #tpu.memory_space<any>> -> memref<1x512xf32, #tpu.memory_space<any>>
    %26 = tpu.memref_slice %arg3[%c6_i32] : memref<8x!tpu.dma_semaphore, #tpu.memory_space<semaphore_mem>> -> memref<1x!tpu.dma_semaphore, #tpu.memory_space<semaphore_mem>>
    %27 = tpu.memref_squeeze %26 : memref<1x!tpu.dma_semaphore, #tpu.memory_space<semaphore_mem>> -> memref<!tpu.dma_semaphore, #tpu.memory_space<semaphore_mem>>
    tpu.enqueue_dma source(%24 : memref<1x512xf32, #tpu.memory_space<any>>) target(%25 : memref<1x512xf32, #tpu.memory_space<any>>) target_semaphore(%27 : memref<!tpu.dma_semaphore, #tpu.memory_space<semaphore_mem>>)
    %c7_i32 = arith.constant 7 : i32
    %c1_i32_25 = arith.constant 1 : i32
    %c512_i32_26 = arith.constant 512 : i32
    %28 = tpu.memref_slice %arg1[%c1_i32_25, %c512_i32_26] : memref<2x1024xf32, #tpu.memory_space<any>> -> memref<1x512xf32, #tpu.memory_space<any>>
    %c1_i32_27 = arith.constant 1 : i32
    %c1536_i32_28 = arith.constant 1536 : i32
    %29 = tpu.memref_slice %arg2[%c1_i32_27, %c1536_i32_28] : memref<2x2048xf32, #tpu.memory_space<any>> -> memref<1x512xf32, #tpu.memory_space<any>>
    %30 = tpu.memref_slice %arg3[%c7_i32] : memref<8x!tpu.dma_semaphore, #tpu.memory_space<semaphore_mem>> -> memref<1x!tpu.dma_semaphore, #tpu.memory_space<semaphore_mem>>
    %31 = tpu.memref_squeeze %30 : memref<1x!tpu.dma_semaphore, #tpu.memory_space<semaphore_mem>> -> memref<!tpu.dma_semaphore, #tpu.memory_space<semaphore_mem>>
    tpu.enqueue_dma source(%28 : memref<1x512xf32, #tpu.memory_space<any>>) target(%29 : memref<1x512xf32, #tpu.memory_space<any>>) target_semaphore(%31 : memref<!tpu.dma_semaphore, #tpu.memory_space<semaphore_mem>>)
    %c0_i32_29 = arith.constant 0 : i32
    %c0_i32_30 = arith.constant 0 : i32
    %c0_i32_31 = arith.constant 0 : i32
    %32 = tpu.memref_slice %arg0[%c0_i32_30, %c0_i32_31] : memref<2x1024xf32, #tpu.memory_space<any>> -> memref<1x512xf32, #tpu.memory_space<any>>
    %c0_i32_32 = arith.constant 0 : i32
    %c0_i32_33 = arith.constant 0 : i32
    %33 = tpu.memref_slice %arg2[%c0_i32_32, %c0_i32_33] : memref<2x2048xf32, #tpu.memory_space<any>> -> memref<1x512xf32, #tpu.memory_space<any>>
    %34 = tpu.memref_slice %arg3[%c0_i32_29] : memref<8x!tpu.dma_semaphore, #tpu.memory_space<semaphore_mem>> -> memref<1x!tpu.dma_semaphore, #tpu.memory_space<semaphore_mem>>
    %35 = tpu.memref_squeeze %34 : memref<1x!tpu.dma_semaphore, #tpu.memory_space<semaphore_mem>> -> memref<!tpu.dma_semaphore, #tpu.memory_space<semaphore_mem>>
    tpu.wait_dma2 semaphore(%35 : memref<!tpu.dma_semaphore, #tpu.memory_space<semaphore_mem>>) src(%32 : memref<1x512xf32, #tpu.memory_space<any>>) dst(%33 : memref<1x512xf32, #tpu.memory_space<any>>)
    %c1_i32_34 = arith.constant 1 : i32
    %c0_i32_35 = arith.constant 0 : i32
    %c512_i32_36 = arith.constant 512 : i32
    %36 = tpu.memref_slice %arg0[%c0_i32_35, %c512_i32_36] : memref<2x1024xf32, #tpu.memory_space<any>> -> memref<1x512xf32, #tpu.memory_space<any>>
    %c0_i32_37 = arith.constant 0 : i32
    %c512_i32_38 = arith.constant 512 : i32
    %37 = tpu.memref_slice %arg2[%c0_i32_37, %c512_i32_38] : memref<2x2048xf32, #tpu.memory_space<any>> -> memref<1x512xf32, #tpu.memory_space<any>>
    %38 = tpu.memref_slice %arg3[%c1_i32_34] : memref<8x!tpu.dma_semaphore, #tpu.memory_space<semaphore_mem>> -> memref<1x!tpu.dma_semaphore, #tpu.memory_space<semaphore_mem>>
    %39 = tpu.memref_squeeze %38 : memref<1x!tpu.dma_semaphore, #tpu.memory_space<semaphore_mem>> -> memref<!tpu.dma_semaphore, #tpu.memory_space<semaphore_mem>>
    tpu.wait_dma2 semaphore(%39 : memref<!tpu.dma_semaphore, #tpu.memory_space<semaphore_mem>>) src(%36 : memref<1x512xf32, #tpu.memory_space<any>>) dst(%37 : memref<1x512xf32, #tpu.memory_space<any>>)
    %c2_i32_39 = arith.constant 2 : i32
    %c1_i32_40 = arith.constant 1 : i32
    %c0_i32_41 = arith.constant 0 : i32
    %40 = tpu.memref_slice %arg0[%c1_i32_40, %c0_i32_41] : memref<2x1024xf32, #tpu.memory_space<any>> -> memref<1x512xf32, #tpu.memory_space<any>>
    %c1_i32_42 = arith.constant 1 : i32
    %c0_i32_43 = arith.constant 0 : i32
    %41 = tpu.memref_slice %arg2[%c1_i32_42, %c0_i32_43] : memref<2x2048xf32, #tpu.memory_space<any>> -> memref<1x512xf32, #tpu.memory_space<any>>
    %42 = tpu.memref_slice %arg3[%c2_i32_39] : memref<8x!tpu.dma_semaphore, #tpu.memory_space<semaphore_mem>> -> memref<1x!tpu.dma_semaphore, #tpu.memory_space<semaphore_mem>>
    %43 = tpu.memref_squeeze %42 : memref<1x!tpu.dma_semaphore, #tpu.memory_space<semaphore_mem>> -> memref<!tpu.dma_semaphore, #tpu.memory_space<semaphore_mem>>
    tpu.wait_dma2 semaphore(%43 : memref<!tpu.dma_semaphore, #tpu.memory_space<semaphore_mem>>) src(%40 : memref<1x512xf32, #tpu.memory_space<any>>) dst(%41 : memref<1x512xf32, #tpu.memory_space<any>>)
    %c3_i32_44 = arith.constant 3 : i32
    %c1_i32_45 = arith.constant 1 : i32
    %c512_i32_46 = arith.constant 512 : i32
    %44 = tpu.memref_slice %arg0[%c1_i32_45, %c512_i32_46] : memref<2x1024xf32, #tpu.memory_space<any>> -> memref<1x512xf32, #tpu.memory_space<any>>
    %c1_i32_47 = arith.constant 1 : i32
    %c512_i32_48 = arith.constant 512 : i32
    %45 = tpu.memref_slice %arg2[%c1_i32_47, %c512_i32_48] : memref<2x2048xf32, #tpu.memory_space<any>> -> memref<1x512xf32, #tpu.memory_space<any>>
    %46 = tpu.memref_slice %arg3[%c3_i32_44] : memref<8x!tpu.dma_semaphore, #tpu.memory_space<semaphore_mem>> -> memref<1x!tpu.dma_semaphore, #tpu.memory_space<semaphore_mem>>
    %47 = tpu.memref_squeeze %46 : memref<1x!tpu.dma_semaphore, #tpu.memory_space<semaphore_mem>> -> memref<!tpu.dma_semaphore, #tpu.memory_space<semaphore_mem>>
    tpu.wait_dma2 semaphore(%47 : memref<!tpu.dma_semaphore, #tpu.memory_space<semaphore_mem>>) src(%44 : memref<1x512xf32, #tpu.memory_space<any>>) dst(%45 : memref<1x512xf32, #tpu.memory_space<any>>)
    %c4_i32_49 = arith.constant 4 : i32
    %c0_i32_50 = arith.constant 0 : i32
    %c0_i32_51 = arith.constant 0 : i32
    %48 = tpu.memref_slice %arg1[%c0_i32_50, %c0_i32_51] : memref<2x1024xf32, #tpu.memory_space<any>> -> memref<1x512xf32, #tpu.memory_space<any>>
    %c0_i32_52 = arith.constant 0 : i32
    %c1024_i32_53 = arith.constant 1024 : i32
    %49 = tpu.memref_slice %arg2[%c0_i32_52, %c1024_i32_53] : memref<2x2048xf32, #tpu.memory_space<any>> -> memref<1x512xf32, #tpu.memory_space<any>>
    %50 = tpu.memref_slice %arg3[%c4_i32_49] : memref<8x!tpu.dma_semaphore, #tpu.memory_space<semaphore_mem>> -> memref<1x!tpu.dma_semaphore, #tpu.memory_space<semaphore_mem>>
    %51 = tpu.memref_squeeze %50 : memref<1x!tpu.dma_semaphore, #tpu.memory_space<semaphore_mem>> -> memref<!tpu.dma_semaphore, #tpu.memory_space<semaphore_mem>>
    tpu.wait_dma2 semaphore(%51 : memref<!tpu.dma_semaphore, #tpu.memory_space<semaphore_mem>>) src(%48 : memref<1x512xf32, #tpu.memory_space<any>>) dst(%49 : memref<1x512xf32, #tpu.memory_space<any>>)
    %c5_i32_54 = arith.constant 5 : i32
    %c0_i32_55 = arith.constant 0 : i32
    %c512_i32_56 = arith.constant 512 : i32
    %52 = tpu.memref_slice %arg1[%c0_i32_55, %c512_i32_56] : memref<2x1024xf32, #tpu.memory_space<any>> -> memref<1x512xf32, #tpu.memory_space<any>>
    %c0_i32_57 = arith.constant 0 : i32
    %c1536_i32_58 = arith.constant 1536 : i32
    %53 = tpu.memref_slice %arg2[%c0_i32_57, %c1536_i32_58] : memref<2x2048xf32, #tpu.memory_space<any>> -> memref<1x512xf32, #tpu.memory_space<any>>
    %54 = tpu.memref_slice %arg3[%c5_i32_54] : memref<8x!tpu.dma_semaphore, #tpu.memory_space<semaphore_mem>> -> memref<1x!tpu.dma_semaphore, #tpu.memory_space<semaphore_mem>>
    %55 = tpu.memref_squeeze %54 : memref<1x!tpu.dma_semaphore, #tpu.memory_space<semaphore_mem>> -> memref<!tpu.dma_semaphore, #tpu.memory_space<semaphore_mem>>
    tpu.wait_dma2 semaphore(%55 : memref<!tpu.dma_semaphore, #tpu.memory_space<semaphore_mem>>) src(%52 : memref<1x512xf32, #tpu.memory_space<any>>) dst(%53 : memref<1x512xf32, #tpu.memory_space<any>>)
    %c6_i32_59 = arith.constant 6 : i32
    %c1_i32_60 = arith.constant 1 : i32
    %c0_i32_61 = arith.constant 0 : i32
    %56 = tpu.memref_slice %arg1[%c1_i32_60, %c0_i32_61] : memref<2x1024xf32, #tpu.memory_space<any>> -> memref<1x512xf32, #tpu.memory_space<any>>
    %c1_i32_62 = arith.constant 1 : i32
    %c1024_i32_63 = arith.constant 1024 : i32
    %57 = tpu.memref_slice %arg2[%c1_i32_62, %c1024_i32_63] : memref<2x2048xf32, #tpu.memory_space<any>> -> memref<1x512xf32, #tpu.memory_space<any>>
    %58 = tpu.memref_slice %arg3[%c6_i32_59] : memref<8x!tpu.dma_semaphore, #tpu.memory_space<semaphore_mem>> -> memref<1x!tpu.dma_semaphore, #tpu.memory_space<semaphore_mem>>
    %59 = tpu.memref_squeeze %58 : memref<1x!tpu.dma_semaphore, #tpu.memory_space<semaphore_mem>> -> memref<!tpu.dma_semaphore, #tpu.memory_space<semaphore_mem>>
    tpu.wait_dma2 semaphore(%59 : memref<!tpu.dma_semaphore, #tpu.memory_space<semaphore_mem>>) src(%56 : memref<1x512xf32, #tpu.memory_space<any>>) dst(%57 : memref<1x512xf32, #tpu.memory_space<any>>)
    %c7_i32_64 = arith.constant 7 : i32
    %c1_i32_65 = arith.constant 1 : i32
    %c512_i32_66 = arith.constant 512 : i32
    %60 = tpu.memref_slice %arg1[%c1_i32_65, %c512_i32_66] : memref<2x1024xf32, #tpu.memory_space<any>> -> memref<1x512xf32, #tpu.memory_space<any>>
    %c1_i32_67 = arith.constant 1 : i32
    %c1536_i32_68 = arith.constant 1536 : i32
    %61 = tpu.memref_slice %arg2[%c1_i32_67, %c1536_i32_68] : memref<2x2048xf32, #tpu.memory_space<any>> -> memref<1x512xf32, #tpu.memory_space<any>>
    %62 = tpu.memref_slice %arg3[%c7_i32_64] : memref<8x!tpu.dma_semaphore, #tpu.memory_space<semaphore_mem>> -> memref<1x!tpu.dma_semaphore, #tpu.memory_space<semaphore_mem>>
    %63 = tpu.memref_squeeze %62 : memref<1x!tpu.dma_semaphore, #tpu.memory_space<semaphore_mem>> -> memref<!tpu.dma_semaphore, #tpu.memory_space<semaphore_mem>>
    tpu.wait_dma2 semaphore(%63 : memref<!tpu.dma_semaphore, #tpu.memory_space<semaphore_mem>>) src(%60 : memref<1x512xf32, #tpu.memory_space<any>>) dst(%61 : memref<1x512xf32, #tpu.memory_space<any>>)
    return
  }
}

</mosaic_0001>

<bundles_post_ra>
// kernel: _lambda_.1
= control target key start
LH: loop header
LB: loop body
LE: loop exit
PB: predicated region body
PF: predicated region fallthrough
CT: control target
= control target key end

     0   :  { %s782_s0 = inlined_call_operand.vmem [shape: f32[2,1024], index: 0, kind: input, shape index: {}]   ;;  %s783_s1 = inlined_call_operand.vmem [shape: f32[2,1024], index: 1, kind: input, shape index: {}]   ;;  %s784_s2 = inlined_call_operand.vmem [shape: f32[2,2048], index: 2, kind: output, shape index: {}]  }
   0x1   :  { %v21_v0 = vld [vmem:[%s782_s0] sm:$0x1]  ;;  %v23_v1 = vld [vmem:[%s782_s0 + $0x2] sm:$0x1]  ;;  %v25_v2 = vld [vmem:[%s782_s0 + $0x4] sm:$0x1] }
   0x2   :  { %22 = vst [vmem:[%s784_s2] sm:$0x1] %v21_v0  ;;  %v27_v3 = vld [vmem:[%s782_s0 + $0x6] sm:$0x1] }
   0x3   :  { %24 = vst [vmem:[%s784_s2 + $0x2] sm:$0x1] %v23_v1 }
   0x4   :  { %26 = vst [vmem:[%s784_s2 + $0x4] sm:$0x1] %v25_v2 }
   0x5   :  { %28 = vst [vmem:[%s784_s2 + $0x6] sm:$0x1] %v27_v3 }
   0x6   :  { %52 = vsyncadd [#allocation2], 64  ;;  %v499_v4 = vld [vmem:[%s782_s0 + $0x8] sm:$0x1]  ;;  %v501_v5 = vld [vmem:[%s782_s0 + $0xa] sm:$0x1] }
   0x7   :  { %500 = vst [vmem:[%s784_s2 + $0x8] sm:$0x1] %v499_v4  ;;  %v503_v6 = vld [vmem:[%s782_s0 + $0xc] sm:$0x1]  ;;  %v505_v7 = vld [vmem:[%s782_s0 + $0xe] sm:$0x1] }
   0x8   :  { %502 = vst [vmem:[%s784_s2 + $0xa] sm:$0x1] %v501_v5 }
   0x9   :  { %504 = vst [vmem:[%s784_s2 + $0xc] sm:$0x1] %v503_v6 }
   0xa   :  { %506 = vst [vmem:[%s784_s2 + $0xe] sm:$0x1] %v505_v7 }
   0xb   :  { %101 = vsyncadd [#allocation2 + $0x1], 64  ;;  %v507_v8 = vld [vmem:[%s782_s0 + $0x1] sm:$0x1]  ;;  %v509_v9 = vld [vmem:[%s782_s0 + $0x3] sm:$0x1] }
   0xc   :  { %508 = vst [vmem:[%s784_s2 + $0x1] sm:$0x1] %v507_v8  ;;  %v511_v10 = vld [vmem:[%s782_s0 + $0x5] sm:$0x1]  ;;  %v513_v11 = vld [vmem:[%s782_s0 + $0x7] sm:$0x1] }
   0xd   :  { %510 = vst [vmem:[%s784_s2 + $0x3] sm:$0x1] %v509_v9 }
   0xe   :  { %512 = vst [vmem:[%s784_s2 + $0x5] sm:$0x1] %v511_v10 }
   0xf   :  { %514 = vst [vmem:[%s784_s2 + $0x7] sm:$0x1] %v513_v11 }
  0x10   :  { %150 = vsyncadd [#allocation2 + $0x2], 64  ;;  %v515_v12 = vld [vmem:[%s782_s0 + $0x9] sm:$0x1]  ;;  %v517_v13 = vld [vmem:[%s782_s0 + $0xb] sm:$0x1] }
  0x11   :  { %516 = vst [vmem:[%s784_s2 + $0x9] sm:$0x1] %v515_v12  ;;  %v519_v14 = vld [vmem:[%s782_s0 + $0xd] sm:$0x1]  ;;  %v521_v15 = vld [vmem:[%s782_s0 + $0xf] sm:$0x1] }
  0x12   :  { %518 = vst [vmem:[%s784_s2 + $0xb] sm:$0x1] %v517_v13 }
  0x13   :  { %520 = vst [vmem:[%s784_s2 + $0xd] sm:$0x1] %v519_v14 }
  0x14   :  { %522 = vst [vmem:[%s784_s2 + $0xf] sm:$0x1] %v521_v15 }
  0x15   :  { %199 = vsyncadd [#allocation2 + $0x3], 64  ;;  %v216_v16 = vld [vmem:[%s783_s1] sm:$0x1]  ;;  %v218_v17 = vld [vmem:[%s783_s1 + $0x2] sm:$0x1] }
  0x16   :  { %523 = vst [vmem:[%s784_s2 + $0x10] sm:$0x1] %v216_v16  ;;  %v220_v18 = vld [vmem:[%s783_s1 + $0x4] sm:$0x1]  ;;  %v222_v19 = vld [vmem:[%s783_s1 + $0x6] sm:$0x1] }
  0x17   :  { %524 = vst [vmem:[%s784_s2 + $0x12] sm:$0x1] %v218_v17 }
  0x18   :  { %525 = vst [vmem:[%s784_s2 + $0x14] sm:$0x1] %v220_v18 }
  0x19   :  { %526 = vst [vmem:[%s784_s2 + $0x16] sm:$0x1] %v222_v19 }
  0x1a   :  { %247 = vsyncadd [#allocation2 + $0x4], 64  ;;  %v527_v20 = vld [vmem:[%s783_s1 + $0x8] sm:$0x1]  ;;  %v529_v21 = vld [vmem:[%s783_s1 + $0xa] sm:$0x1] }
  0x1b   :  { %528 = vst [vmem:[%s784_s2 + $0x18] sm:$0x1] %v527_v20  ;;  %v531_v22 = vld [vmem:[%s783_s1 + $0xc] sm:$0x1]  ;;  %v533_v23 = vld [vmem:[%s783_s1 + $0xe] sm:$0x1] }
  0x1c   :  { %530 = vst [vmem:[%s784_s2 + $0x1a] sm:$0x1] %v529_v21 }
  0x1d   :  { %532 = vst [vmem:[%s784_s2 + $0x1c] sm:$0x1] %v531_v22 }
  0x1e   :  { %534 = vst [vmem:[%s784_s2 + $0x1e] sm:$0x1] %v533_v23 }
  0x1f   :  { %296 = vsyncadd [#allocation2 + $0x5], 64  ;;  %v535_v24 = vld [vmem:[%s783_s1 + $0x1] sm:$0x1]  ;;  %v537_v25 = vld [vmem:[%s783_s1 + $0x3] sm:$0x1] }
  0x20   :  { %536 = vst [vmem:[%s784_s2 + $0x11] sm:$0x1] %v535_v24  ;;  %v539_v26 = vld [vmem:[%s783_s1 + $0x5] sm:$0x1]  ;;  %v541_v27 = vld [vmem:[%s783_s1 + $0x7] sm:$0x1] }
  0x21   :  { %538 = vst [vmem:[%s784_s2 + $0x13] sm:$0x1] %v537_v25 }
  0x22   :  { %540 = vst [vmem:[%s784_s2 + $0x15] sm:$0x1] %v539_v26 }
  0x23   :  { %542 = vst [vmem:[%s784_s2 + $0x17] sm:$0x1] %v541_v27 }
  0x24   :  { %345 = vsyncadd [#allocation2 + $0x6], 64  ;;  %v543_v28 = vld [vmem:[%s783_s1 + $0x9] sm:$0x1]  ;;  %v545_v29 = vld [vmem:[%s783_s1 + $0xb] sm:$0x1] }
  0x25   :  { %544 = vst [vmem:[%s784_s2 + $0x19] sm:$0x1] %v543_v28  ;;  %v547_v30 = vld [vmem:[%s783_s1 + $0xd] sm:$0x1]  ;;  %v549_v31 = vld [vmem:[%s783_s1 + $0xf] sm:$0x1] }
  0x26   :  { %546 = vst [vmem:[%s784_s2 + $0x1b] sm:$0x1] %v545_v29 }
  0x27   :  { %548 = vst [vmem:[%s784_s2 + $0x1d] sm:$0x1] %v547_v30 }
  0x28   :  { %550 = vst [vmem:[%s784_s2 + $0x1f] sm:$0x1] %v549_v31 }
  0x29   :  { %394 = vsyncadd [#allocation2 + $0x7], 64 }
  0x2a   :  { %559 = dma.done.wait [#allocation2], 64 }
  0x2b   :  { %560 = vsyncadd [#allocation2], 4294967232 }
  0x2c   :  { %561 = dma.done.wait [#allocation2 + $0x1], 64 }
  0x2d   :  { %562 = vsyncadd [#allocation2 + $0x1], 4294967232 }
  0x2e   :  { %563 = dma.done.wait [#allocation2 + $0x2], 64 }
  0x2f   :  { %564 = vsyncadd [#allocation2 + $0x2], 4294967232 }
  0x30   :  { %565 = dma.done.wait [#allocation2 + $0x3], 64 }
  0x31   :  { %566 = vsyncadd [#allocation2 + $0x3], 4294967232 }
  0x32   :  { %567 = dma.done.wait [#allocation2 + $0x4], 64 }
  0x33   :  { %568 = vsyncadd [#allocation2 + $0x4], 4294967232 }
  0x34   :  { %569 = dma.done.wait [#allocation2 + $0x5], 64 }
  0x35   :  { %570 = vsyncadd [#allocation2 + $0x5], 4294967232 }
  0x36   :  { %571 = dma.done.wait [#allocation2 + $0x6], 64 }
  0x37   :  { %572 = vsyncadd [#allocation2 + $0x6], 4294967232 }
  0x38   :  { %573 = dma.done.wait [#allocation2 + $0x7], 64 }
  0x39   :  { %574 = vsyncadd [#allocation2 + $0x7], 4294967232 }
  0x3a   :  { %412 = vsyncmov [#allocation2] }
  0x3d   :  { %s413_s1 = vpop.sfrf %412 }
  0x3e   :  { %p551_p0 = scmp.ne.s32.totalorder %s413_s1, 0 }
  0x40   :  { %417 = shalt.err (%p551_p0)  }
  0x41   :  { %419 = vsyncmov [#allocation2 + $0x1] }
  0x44   :  { %s420_s2 = vpop.sfrf %419 }
  0x45   :  { %p552_p1 = scmp.ne.s32.totalorder %s420_s2, 0 }
  0x47   :  { %424 = shalt.err (%p552_p1)  }
  0x48   :  { %426 = vsyncmov [#allocation2 + $0x2] }
  0x4b   :  { %s427_s22 = vpop.sfrf %426 }
  0x4c   :  { %p553_p2 = scmp.ne.s32.totalorder %s427_s22, 0 }
  0x4e   :  { %431 = shalt.err (%p553_p2)  }
  0x4f   :  { %433 = vsyncmov [#allocation2 + $0x3] }
  0x52   :  { %s434_s23 = vpop.sfrf %433 }
  0x53   :  { %p554_p3 = scmp.ne.s32.totalorder %s434_s23, 0 }
  0x55   :  { %438 = shalt.err (%p554_p3)  }
  0x56   :  { %440 = vsyncmov [#allocation2 + $0x4] }
  0x59   :  { %s441_s24 = vpop.sfrf %440 }
  0x5a   :  { %p555_p4 = scmp.ne.s32.totalorder %s441_s24, 0 }
  0x5c   :  { %445 = shalt.err (%p555_p4)  }
  0x5d   :  { %447 = vsyncmov [#allocation2 + $0x5] }
  0x60   :  { %s448_s25 = vpop.sfrf %447 }
  0x61   :  { %p556_p5 = scmp.ne.s32.totalorder %s448_s25, 0 }
  0x63   :  { %452 = shalt.err (%p556_p5)  }
  0x64   :  { %454 = vsyncmov [#allocation2 + $0x6] }
  0x67   :  { %s455_s26 = vpop.sfrf %454 }
  0x68   :  { %p557_p6 = scmp.ne.s32.totalorder %s455_s26, 0 }
  0x6a   :  { %459 = shalt.err (%p557_p6)  }
  0x6b   :  { %461 = vsyncmov [#allocation2 + $0x7] }
  0x6e   :  { %s462_s27 = vpop.sfrf %461 }
  0x6f   :  { %p558_p7 = scmp.ne.s32.totalorder %s462_s27, 0 }
  0x71   :  { %466 = shalt.err (%p558_p7)  }

</bundles_post_ra>
